<compile_context>
chip_gen: v7x
topology: tpu7x:2x2x1
jax: 0.10.0
libtpu: 0.0.40
codegen_flags: <defaults>
</compile_context>

<pallas_src>
import random
import numpy as np
import jax
import jax.numpy as jnp
from jax.experimental import pallas as pl
from jax.experimental.pallas import tpu as pltpu

# ----------------------------- configuration --------------------------------
NET_DEPTH = 6                                   # args.depth
NET_ARCH = [8] * 41                             # net_arch from the script
LAYER_TC = [4, 4, 4, 4, 4, 0]                   # layer_tc (tc[0]==tc[1] so shapes match)
# all_path_num[i] = width of feat_dict[i-2] (the tensor link_dict[i] indexes)
ALL_PATH_NUM = [12, 12, 12, 20, 28, 36]

MAXW = 128                                      # padded lane width
ONES_LANE = 127                                 # constant-1 lane (bias folding)
NUM_CHAINS = 2                                  # interleaved batch sub-chains
F32 = jnp.float32

# per-out column offsets in the global feature buffer:
#   out0 -> [0, 12), out_k (k>=1) -> [12 + 8*(k-1), ...)
OUT0_W = NET_ARCH[0] + LAYER_TC[0]              # 12
OFFS = [0] + [OUT0_W + 8 * k for k in range(NET_DEPTH - 1)]   # offsets of out0..out_{D-2}


# ------------------------------- Pallas kernel -------------------------------
def make_kernel(num_chains):
    def net_kernel(x_ref, w_ref, o_ref):
        wdt = w_ref.dtype                       # bf16 (fast path) or f32 (check path)
        n_mid = w_ref.shape[0] - 2              # static: 4
        rows = x_ref.shape[0] // num_chains     # static

        # ---- layer 0 (relu'd), one independent chain per batch sub-group ----
        feats = []
        for g in range(num_chains):
            xg = x_ref[pl.ds(g * rows, rows), :].astype(wdt)
            feats.append(jnp.maximum(
                jnp.dot(xg, w_ref[0], preferred_element_type=jnp.float32), 0.0))
        # feat columns: [0,12)=relu(out0), lane 127 = 1.0 (bias lane, relu(1)=1)

        # ---- mid layers 1 .. D-2 -------------------------------------------
        for l in range(n_mid):
            w_l = w_ref[1 + l]
            deltas = [jnp.dot(f.astype(wdt), w_l, preferred_element_type=jnp.float32)
                      for f in feats]
            if l < n_mid - 1:
                # fresh 8 output columns, relu'd (zero elsewhere -> add is exact)
                feats = [f + jnp.maximum(d, 0.0) for f, d in zip(feats, deltas)]
            else:
                # last mid layer: keep PRE-activation (torch: no relu before last Linear)
                feats = [f + d for f, d in zip(feats, deltas)]

        # ---- last layer D-1 (reads only out_{D-2} pre-act + bias lane) ------
        w_last = w_ref[1 + n_mid]
        for g in range(num_chains):
            o_ref[pl.ds(g * rows, rows), :] = jnp.dot(
                feats[g].astype(wdt), w_last, preferred_element_type=jnp.float32)
    return net_kernel


def forward_pallas(x_pad, w_all, *, num_chains=NUM_CHAINS, tile_n=None):
    n = x_pad.shape[0]
    if tile_n is None:
        tile_n = n if n <= 512 else 512
    assert n % tile_n == 0 and tile_n % 8 == 0
    chains = num_chains if (tile_n % num_chains == 0
                            and (tile_n // num_chains) % 8 == 0) else 1

    out = pl.pallas_call(
        make_kernel(chains),
        out_shape=jax.ShapeDtypeStruct((n, MAXW), F32),
        grid_spec=pltpu.PrefetchScalarGridSpec(
            num_scalar_prefetch=0,
            grid=(n // tile_n,),
            in_specs=[
                pl.BlockSpec((tile_n, MAXW), lambda i: (i, 0)),            # activations
                pl.BlockSpec((NET_DEPTH, MAXW, MAXW), lambda i: (0, 0, 0)) # weights resident
            ],
            out_specs=pl.BlockSpec((tile_n, MAXW), lambda i: (i, 0)),      # lane-dense out
        ),
        compiler_params=pltpu.CompilerParams(dimension_semantics=("parallel",)),
    )(x_pad, w_all)
    return out[:, :2]                            # final Linear(.., 2)


# --------------------------- parameter construction --------------------------
def featdict_col_to_global(k, c):
    """Map column c of feat_dict[k] = [out_k | out_{k-1} | ... | out_1 | out_0]
    to a column in the global (forward-order) feature buffer."""
    if k == 0:
        return c
    if c < 8 * k:
        seg = c // 8                  # 0 -> out_k, 1 -> out_{k-1}, ...
        which = k - seg
        return OFFS[which] + (c % 8)
    return c - 8 * k                  # out0 segment


def build_params(key):
    """Torch-Linear-style init + link_dict, folded into one stacked effective
    weight tensor (biases live in row ONES_LANE)."""
    rng = random.Random(0)
    link_dict = [rng.sample(list(range(ALL_PATH_NUM[i])), LAYER_TC[i])
                 for i in range(NET_DEPTH)]

    # raw Linear weights/biases, torch convention: W (out, in), y = x W^T + b
    in_dims = [2] + [NET_ARCH[i] + LAYER_TC[i] for i in range(1, NET_DEPTH)]
    out_dims = [NET_ARCH[0] + LAYER_TC[0]] + [NET_ARCH[i] for i in range(1, NET_DEPTH - 1)] + [2]
    weights, biases = [], []
    for l in range(NET_DEPTH):
        key, kw, kb = jax.random.split(key, 3)
        bound = 1.0 / np.sqrt(in_dims[l])
        weights.append(jax.random.uniform(kw, (out_dims[l], in_dims[l]), F32, -bound, bound))
        biases.append(jax.random.uniform(kb, (out_dims[l],), F32, -bound, bound))

    w_np = [np.asarray(w) for w in weights]
    b_np = [np.asarray(b) for b in biases]

    w_all = np.zeros((NET_DEPTH, MAXW, MAXW), np.float32)

    # layer 0: x cols [0,2) -> feature cols [0, OUT0_W); bias in row ONES_LANE
    w_all[0, 0:2, 0:OUT0_W] = w_np[0].T
    w_all[0, ONES_LANE, 0:OUT0_W] = b_np[0]
    w_all[0, ONES_LANE, ONES_LANE] = 1.0        # propagate the ones-lane (relu(1)=1)

    # middle layers 1 .. D-2
    for l in range(1, NET_DEPTH - 1):
        if l == 1:
            in_cols = list(range(OUT0_W))                              # out0
        else:
            in_cols = list(range(OFFS[l - 1], OFFS[l - 1] + 8))        # out_{l-1}
            in_cols += [featdict_col_to_global(l - 2, c) for c in link_dict[l]]
        out_off = OFFS[l]
        W = w_np[l]                                                    # (8, in_dim)
        for i, g in enumerate(in_cols):
            w_all[l, g, out_off:out_off + 8] += W[:, i]
        w_all[l, ONES_LANE, out_off:out_off + 8] = b_np[l]

    # last layer D-1 (LAYER_TC[-1] == 0: reads only out_{D-2})
    l = NET_DEPTH - 1
    in_cols = list(range(OFFS[l - 1], OFFS[l - 1] + 8))
    in_cols += [featdict_col_to_global(l - 2, c) for c in link_dict[l]]
    W = w_np[l]                                                        # (2, in_dim)
    for i, g in enumerate(in_cols):
        w_all[l, g, 0:2] += W[:, i]
    w_all[l, ONES_LANE, 0:2] = b_np[l]

    return jnp.asarray(w_all), weights, biases, link_dict


# ------------------------- pure-JAX reference (torch semantics) --------------
def reference_forward(x, weights, biases, link_dict):
    def linear(h, l):
        return h @ weights[l].T + biases[l]

    out0 = jax.nn.relu(linear(x, 0))
    out1 = linear(out0, 1)
    out_dict = [out0, out1]
    feat_dict = [out0, jnp.concatenate([out1, out0], axis=1)]
    for layer_idx in range(NET_DEPTH - 2):
        in_features = feat_dict[layer_idx]
        if LAYER_TC[layer_idx + 2] > 0:
            idx = jnp.asarray(link_dict[layer_idx + 2], dtype=jnp.int32)
            in_tmp = jnp.concatenate([out_dict[layer_idx + 1], in_features[:, idx]], axis=1)
        else:
            in_tmp = out_dict[layer_idx + 1]
        if layer_idx < NET_DEPTH - 3:
            out_tmp = linear(jax.nn.relu(in_tmp), layer_idx + 2)
        else:
            out_tmp = linear(in_tmp, layer_idx + 2)
        feat_dict.append(jnp.concatenate([out_tmp, feat_dict[layer_idx + 1]], axis=1))
        out_dict.append(out_tmp)
    return out_dict[NET_DEPTH - 1]


# ------------------------------------ main -----------------------------------
if __name__ == "__main__":
    key = jax.random.PRNGKey(0)
    key, kx = jax.random.split(key)

    N = 32
    x = jax.random.normal(kx, (N, 2), dtype=F32)      # module input: (batch, 2)

    w_all_f32, weights, biases, link_dict = build_params(key)

    # pad input to 128 lanes; lane 127 is the constant-1 bias lane
    x_pad = (jnp.zeros((N, MAXW), F32)
             .at[:, :2].set(x)
             .at[:, ONES_LANE].set(1.0))

    ref = jax.block_until_ready(reference_forward(x, weights, biases, link_dict))

    # (1) exact-math f32 path: verifies the folded-weight / folded-bias structure
    out_f32 = jax.block_until_ready(forward_pallas(x_pad, w_all_f32))
    np.testing.assert_allclose(np.asarray(out_f32), np.asarray(ref), rtol=1e-4, atol=1e-4)

    # (2) performance path: bf16 matmul inputs, f32 accumulation / elementwise
    out_bf16 = jax.block_until_ready(forward_pallas(x_pad, w_all_f32.astype(jnp.bfloat16)))
    np.testing.assert_allclose(np.asarray(out_bf16), np.asarray(ref), rtol=5e-2, atol=5e-2)

    print("KERNEL_OK")
</pallas_src>

<mosaic_0001>
module attributes {stable_mosaic.version = 11 : i64} {
  func.func @net_kernel(%arg0: i32, %arg1: memref<32x128xf32, #tpu.memory_space<vmem>>, %arg2: memref<6x128x128xf32, #tpu.memory_space<vmem>>, %arg3: memref<32x128xf32, #tpu.memory_space<vmem>>) attributes {dimension_semantics = [#tpu.dimension_semantics<parallel>], iteration_bounds = array<i64: 1>, scalar_prefetch = 0 : i64, scratch_operands = 0 : i64, tpu.core_type = #tpu.core_type<tc>, window_params = [{transform_indices = @transform_0, window_bounds = array<i64: 32, 128>}, {pipeline_mode = #tpu.pipeline_mode<synchronous>, transform_indices = @transform_1, window_bounds = array<i64: 6, 128, 128>}, {transform_indices = @transform_2, window_bounds = array<i64: 32, 128>}]} {
    %c0 = arith.constant 0 : index
    %c0_0 = arith.constant 0 : index
    %0 = vector.load %arg1[%c0, %c0_0] : memref<32x128xf32, #tpu.memory_space<vmem>>, vector<16x128xf32>
    %c0_1 = arith.constant 0 : index
    %c0_2 = arith.constant 0 : index
    %c0_3 = arith.constant 0 : index
    %1 = vector.load %arg2[%c0_1, %c0_2, %c0_3] : memref<6x128x128xf32, #tpu.memory_space<vmem>>, vector<1x128x128xf32>
    %2 = vector.shape_cast %1 : vector<1x128x128xf32> to vector<128x128xf32>
    %cst = arith.constant dense<0.000000e+00> : vector<16x128xf32>
    %3 = tpu.matmul %0, %2, %cst {dimension_numbers = #tpu.dot_dimension_numbers<[1], [0], [0], [1], [0, 0, 1, 1], [], []>} : vector<16x128xf32>, vector<128x128xf32>, vector<16x128xf32> -> vector<16x128xf32>
    %cst_4 = arith.constant 0.000000e+00 : f32
    %4 = vector.broadcast %cst_4 : f32 to vector<16x128xf32>
    %5 = arith.maximumf %3, %4 : vector<16x128xf32>
    %c16 = arith.constant 16 : index
    %c0_5 = arith.constant 0 : index
    %6 = vector.load %arg1[%c16, %c0_5] : memref<32x128xf32, #tpu.memory_space<vmem>>, vector<16x128xf32>
    %c0_6 = arith.constant 0 : index
    %c0_7 = arith.constant 0 : index
    %c0_8 = arith.constant 0 : index
    %7 = vector.load %arg2[%c0_6, %c0_7, %c0_8] : memref<6x128x128xf32, #tpu.memory_space<vmem>>, vector<1x128x128xf32>
    %8 = vector.shape_cast %7 : vector<1x128x128xf32> to vector<128x128xf32>
    %cst_9 = arith.constant dense<0.000000e+00> : vector<16x128xf32>
    %9 = tpu.matmul %6, %8, %cst_9 {dimension_numbers = #tpu.dot_dimension_numbers<[1], [0], [0], [1], [0, 0, 1, 1], [], []>} : vector<16x128xf32>, vector<128x128xf32>, vector<16x128xf32> -> vector<16x128xf32>
    %cst_10 = arith.constant 0.000000e+00 : f32
    %10 = vector.broadcast %cst_10 : f32 to vector<16x128xf32>
    %11 = arith.maximumf %9, %10 : vector<16x128xf32>
    %c1 = arith.constant 1 : index
    %c0_11 = arith.constant 0 : index
    %c0_12 = arith.constant 0 : index
    %12 = vector.load %arg2[%c1, %c0_11, %c0_12] : memref<6x128x128xf32, #tpu.memory_space<vmem>>, vector<1x128x128xf32>
    %13 = vector.shape_cast %12 : vector<1x128x128xf32> to vector<128x128xf32>
    %cst_13 = arith.constant dense<0.000000e+00> : vector<16x128xf32>
    %14 = tpu.matmul %5, %13, %cst_13 {dimension_numbers = #tpu.dot_dimension_numbers<[1], [0], [0], [1], [0, 0, 1, 1], [], []>} : vector<16x128xf32>, vector<128x128xf32>, vector<16x128xf32> -> vector<16x128xf32>
    %cst_14 = arith.constant dense<0.000000e+00> : vector<16x128xf32>
    %15 = tpu.matmul %11, %13, %cst_14 {dimension_numbers = #tpu.dot_dimension_numbers<[1], [0], [0], [1], [0, 0, 1, 1], [], []>} : vector<16x128xf32>, vector<128x128xf32>, vector<16x128xf32> -> vector<16x128xf32>
    %cst_15 = arith.constant 0.000000e+00 : f32
    %16 = vector.broadcast %cst_15 : f32 to vector<16x128xf32>
    %17 = arith.maximumf %14, %16 : vector<16x128xf32>
    %18 = arith.addf %5, %17 : vector<16x128xf32>
    %cst_16 = arith.constant 0.000000e+00 : f32
    %19 = vector.broadcast %cst_16 : f32 to vector<16x128xf32>
    %20 = arith.maximumf %15, %19 : vector<16x128xf32>
    %21 = arith.addf %11, %20 : vector<16x128xf32>
    %c2 = arith.constant 2 : index
    %c0_17 = arith.constant 0 : index
    %c0_18 = arith.constant 0 : index
    %22 = vector.load %arg2[%c2, %c0_17, %c0_18] : memref<6x128x128xf32, #tpu.memory_space<vmem>>, vector<1x128x128xf32>
    %23 = vector.shape_cast %22 : vector<1x128x128xf32> to vector<128x128xf32>
    %cst_19 = arith.constant dense<0.000000e+00> : vector<16x128xf32>
    %24 = tpu.matmul %18, %23, %cst_19 {dimension_numbers = #tpu.dot_dimension_numbers<[1], [0], [0], [1], [0, 0, 1, 1], [], []>} : vector<16x128xf32>, vector<128x128xf32>, vector<16x128xf32> -> vector<16x128xf32>
    %cst_20 = arith.constant dense<0.000000e+00> : vector<16x128xf32>
    %25 = tpu.matmul %21, %23, %cst_20 {dimension_numbers = #tpu.dot_dimension_numbers<[1], [0], [0], [1], [0, 0, 1, 1], [], []>} : vector<16x128xf32>, vector<128x128xf32>, vector<16x128xf32> -> vector<16x128xf32>
    %cst_21 = arith.constant 0.000000e+00 : f32
    %26 = vector.broadcast %cst_21 : f32 to vector<16x128xf32>
    %27 = arith.maximumf %24, %26 : vector<16x128xf32>
    %28 = arith.addf %18, %27 : vector<16x128xf32>
    %cst_22 = arith.constant 0.000000e+00 : f32
    %29 = vector.broadcast %cst_22 : f32 to vector<16x128xf32>
    %30 = arith.maximumf %25, %29 : vector<16x128xf32>
    %31 = arith.addf %21, %30 : vector<16x128xf32>
    %c3 = arith.constant 3 : index
    %c0_23 = arith.constant 0 : index
    %c0_24 = arith.constant 0 : index
    %32 = vector.load %arg2[%c3, %c0_23, %c0_24] : memref<6x128x128xf32, #tpu.memory_space<vmem>>, vector<1x128x128xf32>
    %33 = vector.shape_cast %32 : vector<1x128x128xf32> to vector<128x128xf32>
    %cst_25 = arith.constant dense<0.000000e+00> : vector<16x128xf32>
    %34 = tpu.matmul %28, %33, %cst_25 {dimension_numbers = #tpu.dot_dimension_numbers<[1], [0], [0], [1], [0, 0, 1, 1], [], []>} : vector<16x128xf32>, vector<128x128xf32>, vector<16x128xf32> -> vector<16x128xf32>
    %cst_26 = arith.constant dense<0.000000e+00> : vector<16x128xf32>
    %35 = tpu.matmul %31, %33, %cst_26 {dimension_numbers = #tpu.dot_dimension_numbers<[1], [0], [0], [1], [0, 0, 1, 1], [], []>} : vector<16x128xf32>, vector<128x128xf32>, vector<16x128xf32> -> vector<16x128xf32>
    %cst_27 = arith.constant 0.000000e+00 : f32
    %36 = vector.broadcast %cst_27 : f32 to vector<16x128xf32>
    %37 = arith.maximumf %34, %36 : vector<16x128xf32>
    %38 = arith.addf %28, %37 : vector<16x128xf32>
    %cst_28 = arith.constant 0.000000e+00 : f32
    %39 = vector.broadcast %cst_28 : f32 to vector<16x128xf32>
    %40 = arith.maximumf %35, %39 : vector<16x128xf32>
    %41 = arith.addf %31, %40 : vector<16x128xf32>
    %c4 = arith.constant 4 : index
    %c0_29 = arith.constant 0 : index
    %c0_30 = arith.constant 0 : index
    %42 = vector.load %arg2[%c4, %c0_29, %c0_30] : memref<6x128x128xf32, #tpu.memory_space<vmem>>, vector<1x128x128xf32>
    %43 = vector.shape_cast %42 : vector<1x128x128xf32> to vector<128x128xf32>
    %cst_31 = arith.constant dense<0.000000e+00> : vector<16x128xf32>
    %44 = tpu.matmul %38, %43, %cst_31 {dimension_numbers = #tpu.dot_dimension_numbers<[1], [0], [0], [1], [0, 0, 1, 1], [], []>} : vector<16x128xf32>, vector<128x128xf32>, vector<16x128xf32> -> vector<16x128xf32>
    %cst_32 = arith.constant dense<0.000000e+00> : vector<16x128xf32>
    %45 = tpu.matmul %41, %43, %cst_32 {dimension_numbers = #tpu.dot_dimension_numbers<[1], [0], [0], [1], [0, 0, 1, 1], [], []>} : vector<16x128xf32>, vector<128x128xf32>, vector<16x128xf32> -> vector<16x128xf32>
    %46 = arith.addf %38, %44 : vector<16x128xf32>
    %47 = arith.addf %41, %45 : vector<16x128xf32>
    %c5 = arith.constant 5 : index
    %c0_33 = arith.constant 0 : index
    %c0_34 = arith.constant 0 : index
    %48 = vector.load %arg2[%c5, %c0_33, %c0_34] : memref<6x128x128xf32, #tpu.memory_space<vmem>>, vector<1x128x128xf32>
    %49 = vector.shape_cast %48 : vector<1x128x128xf32> to vector<128x128xf32>
    %cst_35 = arith.constant dense<0.000000e+00> : vector<16x128xf32>
    %50 = tpu.matmul %46, %49, %cst_35 {dimension_numbers = #tpu.dot_dimension_numbers<[1], [0], [0], [1], [0, 0, 1, 1], [], []>} : vector<16x128xf32>, vector<128x128xf32>, vector<16x128xf32> -> vector<16x128xf32>
    %c0_36 = arith.constant 0 : index
    %c0_37 = arith.constant 0 : index
    %51 = vector.load %arg3[%c0_36, %c0_37] : memref<32x128xf32, #tpu.memory_space<vmem>>, vector<16x128xf32>
    tpu.vector_store %arg3[%c0_36, %c0_37], %50 {strides = array<i32>} : memref<32x128xf32, #tpu.memory_space<vmem>>, vector<16x128xf32>,
    %cst_38 = arith.constant dense<0.000000e+00> : vector<16x128xf32>
    %52 = tpu.matmul %47, %49, %cst_38 {dimension_numbers = #tpu.dot_dimension_numbers<[1], [0], [0], [1], [0, 0, 1, 1], [], []>} : vector<16x128xf32>, vector<128x128xf32>, vector<16x128xf32> -> vector<16x128xf32>
    %c16_39 = arith.constant 16 : index
    %c0_40 = arith.constant 0 : index
    %53 = vector.load %arg3[%c16_39, %c0_40] : memref<32x128xf32, #tpu.memory_space<vmem>>, vector<16x128xf32>
    tpu.vector_store %arg3[%c16_39, %c0_40], %52 {strides = array<i32>} : memref<32x128xf32, #tpu.memory_space<vmem>>, vector<16x128xf32>,
    return
  }
  func.func @transform_0(%arg0: i32) -> (i32, i32) {
    %c0_i32 = arith.constant 0 : i32
    %c0_i32_0 = arith.constant 0 : i32
    return %arg0, %c0_i32 : i32, i32
  }
  func.func @transform_1(%arg0: i32) -> (i32, i32, i32) {
    %c0_i32 = arith.constant 0 : i32
    %c0_i32_0 = arith.constant 0 : i32
    %c0_i32_1 = arith.constant 0 : i32
    %c0_i32_2 = arith.constant 0 : i32
    return %c0_i32, %c0_i32_0, %c0_i32_1 : i32, i32, i32
  }
  func.func @transform_2(%arg0: i32) -> (i32, i32) {
    %c0_i32 = arith.constant 0 : i32
    %c0_i32_0 = arith.constant 0 : i32
    return %arg0, %c0_i32 : i32, i32
  }
}

</mosaic_0001>

<bundles_post_ra>
// kernel: tpu_custom_call.1
= control target key start
LH: loop header
LB: loop body
LE: loop exit
PB: predicated region body
PF: predicated region fallthrough
CT: control target
= control target key end

     0   :  { %7 = vsyncpa [#allocation3], 0  ;;  %s2321_s0 = inlined_call_operand.hbm [shape: f32[32,128], index: 0, kind: input, shape index: {}]   ;;  %s2322_s1 = inlined_call_operand.hbm [shape: f32[6,128,128], index: 1, kind: input, shape index: {}]   ;;  %s2323_s2 = inlined_call_operand.hbm [shape: f32[32,128], index: 2, kind: output, shape index: {}]  }
   0x1   :  { %8 = vsyncpa [#allocation6], 0 }
   0x2   :  { %9 = vsyncpa [#allocation4], 0  ;;  %s2196_s9 = smov [#allocation2]   ;;  %s2124_s13 = scalar_lea.hbm %s2321_s0, 512 }
   0x3   :  { %s15_s10 = sshll.u32 %s2196_s9, 4  ;;  %p2125_p0 = scmp.ne.s32.totalorder %s2321_s0, %s2124_s13  ;;  %s16_s10 = int_to_ptr.vmem [resolvable:$true] %s15_s10 }
   0x4   :  { %p2128_p1 = scmp.lt.u32.totalorder %s2124_s13, %s2321_s0 }
   0x6   :  { %p2130_p2 = pnand %p2128_p1, %p2125_p0 }
   0x8   :  { %2133 = shalt.err (!%p2130_p2)
}
   0x9   :  { %s2134_s18 = scalar_lea.vmem %s16_s10, 512  ;;  %p2139_p4 = scmp.lt.s32.totalorder %s16_s10, %s16_s10 }
   0xa   :  { %p2135_p3 = scmp.ne.s32.totalorder %s16_s10, %s2134_s18  ;;  %p2140_p5 = scmp.lt.s32.totalorder %s2134_s18, %s2134_s18 }
   0xc   :  { %p2141_p6 = por %p2140_p5, %p2139_p4 }
   0xe   :  { %p2142_p7 = pnand %p2141_p6, %p2135_p3 }
  0x10   :  { %2145 = shalt.err (!%p2142_p7)
}
  0x11   :  { %s2197_s19 = smov 128   ;;  %s2198_s20 = smov 8  }
  0x12   :  { %21 = dma.hbm_to_vmem [thread:$0]  %s2321_s0, 512, %s16_s10, [#allocation3], %s2197_s19, %s2197_s19, %s2198_s20  }
  0x13   :  { %s2199_s23 = smov [#allocation5]   ;;  %s2146_s27 = scalar_lea.hbm %s2322_s1, 12288 }
  0x14   :  { %s27_s24 = sshll.u32 %s2199_s23, 4  ;;  %p2147_p8 = scmp.ne.s32.totalorder %s2322_s1, %s2146_s27  ;;  %s28_s24 = int_to_ptr.vmem [resolvable:$true] %s27_s24 }
  0x15   :  { %p2150_p9 = scmp.lt.u32.totalorder %s2146_s27, %s2322_s1 }
  0x17   :  { %p2152_p10 = pnand %p2150_p9, %p2147_p8 }
  0x19   :  { %2155 = shalt.err (!%p2152_p10)
}
  0x1a   :  { %s2156_s4 = scalar_lea.vmem %s28_s24, 12288  ;;  %p2161_p12 = scmp.lt.s32.totalorder %s28_s24, %s28_s24 }
  0x1b   :  { %p2157_p11 = scmp.ne.s32.totalorder %s28_s24, %s2156_s4  ;;  %p2162_p13 = scmp.lt.s32.totalorder %s2156_s4, %s2156_s4 }
  0x1d   :  { %p2163_p0 = por %p2162_p13, %p2161_p12 }
  0x1f   :  { %p2164_p1 = pnand %p2163_p0, %p2157_p11 }
  0x21   :  { %2167 = shalt.err (!%p2164_p1)
}
  0x22   :  { %33 = dma.hbm_to_vmem [thread:$0]  %s2322_s1, 12288, %s28_s24, [#allocation6], %s2197_s19, %s2197_s19, %s2198_s20  }
  0x23   :  { %2190 = dma.done.wait [#allocation3], 512  }
  0x24   :  { %2191 = vsyncadd [#allocation3], 4294966784 }
  0x25   :  { %2192 = dma.done.wait [#allocation6], 12288  }
  0x26   :  { %2193 = vsyncadd [#allocation6], 4294955008  ;;  %v42_v0 = vld [vmem:[#allocation5] sm:$0xff]  ;;  %v43_v1 = vld [vmem:[#allocation5 + $0x8] sm:$0xff]  ;;  %s2200_s1 = smov [#allocation7]  }
  0x27   :  { %v44_v2 = vld [vmem:[#allocation5 + $0x10] sm:$0xff]  ;;  %v1735_v3 = vpack.c.bf16 %v43_v1, %v42_v0  ;;  %v45_v4 = vld [vmem:[#allocation5 + $0x18] sm:$0xff]  ;;  %v46_v6 = vld [vmem:[#allocation5 + $0x20] sm:$0xff]  ;;  %s1086_s6 = sshll.u32 %s2200_s1, 4  ;;  %s1087_s6 = int_to_ptr.vmem [resolvable:$true] %s1086_s6 }
  0x28   :  { %v1739_v5 = vpack.c.bf16 %v45_v4, %v44_v2  ;;  %v47_v7 = vld [vmem:[#allocation5 + $0x28] sm:$0xff]  ;;  %v40_v9 = vld [vmem:[#allocation2] sm:$0xff]  ;;  %v135_v10 = vld [vmem:[#allocation2 + $0x10] sm:$0xff]  ;;  %s2168_s7 = scalar_lea.vmem %s1087_s6, 512  ;;  %p2173_p3 = scmp.lt.s32.totalorder %s1087_s6, %s1087_s6 }
  0x29   :  { %1736 = vmatprep.subr.bf16.mxu0 %v1735_v3  ;;  %1768 = vmatprep.subr.bf16.mxu1 %v1735_v3  ;;  %v1743_v8 = vpack.c.bf16 %v47_v7, %v46_v6  ;;  %v48_v11 = vld [vmem:[#allocation5 + $0x30] sm:$0xff]  ;;  %v49_v12 = vld [vmem:[#allocation5 + $0x38] sm:$0xff]  ;;  %v50_v14 = vld [vmem:[#allocation5 + $0x40] sm:$0xff]  ;;  %p2169_p2 = scmp.ne.s32.totalorder %s1087_s6, %s2168_s7  ;;  %p2174_p4 = scmp.lt.s32.totalorder %s2168_s7, %s2168_s7 }
  0x2a   :  { %1738 = vmatpush3.bf16.msra.mxu0 %v1735_v3  ;;  %1770 = vmatpush3.bf16.msra.mxu1 %v1735_v3  ;;  %v1747_v13 = vpack.c.bf16 %v49_v12, %v48_v11  ;;  %v51_v15 = vld [vmem:[#allocation5 + $0x48] sm:$0xff]  ;;  %v52_v17 = vld [vmem:[#allocation5 + $0x50] sm:$0xff]  ;;  %v53_v18 = vld [vmem:[#allocation5 + $0x58] sm:$0xff] }
  0x2b   :  { %1740 = vmatprep.subr.bf16.mxu0 %v1739_v5  ;;  %1772 = vmatprep.subr.bf16.mxu1 %v1739_v5  ;;  %v1751_v16 = vpack.c.bf16 %v51_v15, %v50_v14  ;;  %v1755_v19 = vpack.c.bf16 %v53_v18, %v52_v17  ;;  %v54_v20 = vld [vmem:[#allocation5 + $0x60] sm:$0xff]  ;;  %v55_v21 = vld [vmem:[#allocation5 + $0x68] sm:$0xff]  ;;  %v56_v23 = vld [vmem:[#allocation5 + $0x70] sm:$0xff]  ;;  %p2175_p5 = por %p2174_p4, %p2173_p3 }
  0x2c   :  { %1347 = vmatprep.mubr.f32.mxu0 %v40_v9  ;;  %1382 = vmatprep.mubr.f32.mxu1 %v135_v10  ;;  %v1759_v22 = vpack.c.bf16 %v55_v21, %v54_v20  ;;  %v57_v24 = vld [vmem:[#allocation5 + $0x78] sm:$0xff]  ;;  %v215_v26 = vld [vmem:[#allocation5 + $0x80] sm:$0xff]  ;;  %v216_v27 = vld [vmem:[#allocation5 + $0x88] sm:$0xff] }
  0x2d   :  { %v1763_v25 = vpack.c.bf16 %v57_v24, %v56_v23  ;;  %v1799_v28 = vpack.c.bf16 %v216_v27, %v215_v26  ;;  %v217_v29 = vld [vmem:[#allocation5 + $0x90] sm:$0xff]  ;;  %v218_v30 = vld [vmem:[#allocation5 + $0x98] sm:$0xff]  ;;  %v41_v31 = vld [vmem:[#allocation2 + $0x8] sm:$0xff]  ;;  %p2176_p6 = pnand %p2175_p5, %p2169_p2 }
  0x2e   :  { %1742 = vmatpush3.bf16.msra.mxu0 %v1739_v5  ;;  %1774 = vmatpush3.bf16.msra.mxu1 %v1739_v5  ;;  %v136_v32 = vld [vmem:[#allocation2 + $0x18] sm:$0xff]  ;;  %v1803_v33 = vpack.c.bf16 %v218_v30, %v217_v29  ;;  %v219_v34 = vld [vmem:[#allocation5 + $0xa0] sm:$0xff]  ;;  %v220_v35 = vld [vmem:[#allocation5 + $0xa8] sm:$0xff] }
  0x2f   :  { %1744 = vmatprep.subr.bf16.mxu0 %v1743_v8  ;;  %1776 = vmatprep.subr.bf16.mxu1 %v1743_v8  ;;  %v1807_v36 = vpack.c.bf16 %v220_v35, %v219_v34  ;;  %v221_v37 = vld [vmem:[#allocation5 + $0xb0] sm:$0xff]  ;;  %v222_v38 = vld [vmem:[#allocation5 + $0xb8] sm:$0xff]  ;;  %v223_v40 = vld [vmem:[#allocation5 + $0xc0] sm:$0xff] }
  0x30   :  { %v1811_v39 = vpack.c.bf16 %v222_v38, %v221_v37  ;;  %v224_v41 = vld [vmem:[#allocation5 + $0xc8] sm:$0xff]  ;;  %v225_v43 = vld [vmem:[#allocation5 + $0xd0] sm:$0xff]  ;;  %v226_v44 = vld [vmem:[#allocation5 + $0xd8] sm:$0xff] }
  0x31   :  { %v1815_v42 = vpack.c.bf16 %v224_v41, %v223_v40  ;;  %v1819_v45 = vpack.c.bf16 %v226_v44, %v225_v43  ;;  %v227_v46 = vld [vmem:[#allocation5 + $0xe0] sm:$0xff]  ;;  %v228_v47 = vld [vmem:[#allocation5 + $0xe8] sm:$0xff]  ;;  %v229_v49 = vld [vmem:[#allocation5 + $0xf0] sm:$0xff] }
  0x32   :  { %1746 = vmatpush3.bf16.msra.mxu0 %v1743_v8  ;;  %1778 = vmatpush3.bf16.msra.mxu1 %v1743_v8  ;;  %v1823_v48 = vpack.c.bf16 %v228_v47, %v227_v46  ;;  %v230_v50 = vld [vmem:[#allocation5 + $0xf8] sm:$0xff]  ;;  %v390_v52 = vld [vmem:[#allocation5 + $0x100] sm:$0xff]  ;;  %v391_v53 = vld [vmem:[#allocation5 + $0x108] sm:$0xff] }
  0x33   :  { %1748 = vmatprep.subr.bf16.mxu0 %v1747_v13  ;;  %1780 = vmatprep.subr.bf16.mxu1 %v1747_v13  ;;  %v1827_v51 = vpack.c.bf16 %v230_v50, %v229_v49  ;;  %v1863_v54 = vpack.c.bf16 %v391_v53, %v390_v52  ;;  %v392_v57 = vld [vmem:[#allocation5 + $0x110] sm:$0xff]  ;;  %v393_v58 = vld [vmem:[#allocation5 + $0x118] sm:$0xff]  ;;  %v394_v2 = vld [vmem:[#allocation5 + $0x120] sm:$0xff] }
  0x34   :  { %v1867_v1 = vpack.c.bf16 %v393_v58, %v392_v57  ;;  %v395_v3 = vld [vmem:[#allocation5 + $0x128] sm:$0xff]  ;;  %v396_v5 = vld [vmem:[#allocation5 + $0x130] sm:$0xff]  ;;  %v397_v6 = vld [vmem:[#allocation5 + $0x138] sm:$0xff] }
  0x35   :  { %v1871_v4 = vpack.c.bf16 %v395_v3, %v394_v2  ;;  %v1875_v7 = vpack.c.bf16 %v397_v6, %v396_v5  ;;  %v398_v8 = vld [vmem:[#allocation5 + $0x140] sm:$0xff]  ;;  %v399_v9 = vld [vmem:[#allocation5 + $0x148] sm:$0xff]  ;;  %v400_v11 = vld [vmem:[#allocation5 + $0x150] sm:$0xff] }
  0x36   :  { %1750 = vmatpush3.bf16.msra.mxu0 %v1747_v13  ;;  %1782 = vmatpush3.bf16.msra.mxu1 %v1747_v13  ;;  %v1879_v10 = vpack.c.bf16 %v399_v9, %v398_v8  ;;  %v401_v12 = vld [vmem:[#allocation5 + $0x158] sm:$0xff]  ;;  %v402_v14 = vld [vmem:[#allocation5 + $0x160] sm:$0xff]  ;;  %v403_v15 = vld [vmem:[#allocation5 + $0x168] sm:$0xff] }
  0x37   :  { %1752 = vmatprep.subr.bf16.mxu0 %v1751_v16  ;;  %1784 = vmatprep.subr.bf16.mxu1 %v1751_v16  ;;  %v1883_v13 = vpack.c.bf16 %v401_v12, %v400_v11  ;;  %v404_v17 = vld [vmem:[#allocation5 + $0x170] sm:$0xff]  ;;  %v405_v18 = vld [vmem:[#allocation5 + $0x178] sm:$0xff]  ;;  %v565_v20 = vld [vmem:[#allocation5 + $0x180] sm:$0xff] }
  0x38   :  { %v566_v21 = vld [vmem:[#allocation5 + $0x188] sm:$0xff]  ;;  %v569_v38 = vld [vmem:[#allocation5 + $0x1a0] sm:$0xff]  ;;  %v571_v41 = vld [vmem:[#allocation5 + $0x1b0] sm:$0xff] }
  0x39   :  { %v573_v44 = vld [vmem:[#allocation5 + $0x1c0] sm:$0xff]  ;;  %v575_v47 = vld [vmem:[#allocation5 + $0x1d0] sm:$0xff]  ;;  %v741_v57 = vld [vmem:[#allocation5 + $0x208] sm:$0xff] }
  0x3a   :  { %1754 = vmatpush3.bf16.msra.mxu0 %v1751_v16  ;;  %1786 = vmatpush3.bf16.msra.mxu1 %v1751_v16  ;;  %v1887_v16 = vpack.c.bf16 %v403_v15, %v402_v14  ;;  %v577_v50 = vld [vmem:[#allocation5 + $0x1e0] sm:$0xff]  ;;  %v579_v53 = vld [vmem:[#allocation5 + $0x1f0] sm:$0xff]  ;;  %v745_v11 = vld [vmem:[#allocation5 + $0x228] sm:$0xff] }
  0x3b   :  { %1756 = vmatprep.subr.bf16.mxu0 %v1755_v19  ;;  %1788 = vmatprep.subr.bf16.mxu1 %v1755_v19  ;;  %v742_v3 = vld [vmem:[#allocation5 + $0x210] sm:$0xff]  ;;  %v747_v14 = vld [vmem:[#allocation5 + $0x238] sm:$0xff] }
  0x3e   :  { %1758 = vmatpush3.bf16.msra.mxu0 %v1755_v19  ;;  %1790 = vmatpush3.bf16.msra.mxu1 %v1755_v19  ;;  %v1891_v19 = vpack.c.bf16 %v405_v18, %v404_v17  ;;  %v749_v17 = vld [vmem:[#allocation5 + $0x248] sm:$0xff] }
  0x3f   :  { %1760 = vmatprep.subr.bf16.mxu0 %v1759_v22  ;;  %1792 = vmatprep.subr.bf16.mxu1 %v1759_v22 }
  0x42   :  { %1762 = vmatpush3.bf16.msra.mxu0 %v1759_v22  ;;  %1794 = vmatpush3.bf16.msra.mxu1 %v1759_v22  ;;  %v1927_v22 = vpack.c.bf16 %v566_v21, %v565_v20  ;;  %v751_v20 = vld [vmem:[#allocation5 + $0x258] sm:$0xff] }
  0x43   :  { %1764 = vmatprep.subr.bf16.mxu0 %v1763_v25  ;;  %1796 = vmatprep.subr.bf16.mxu1 %v1763_v25 }
  0x46   :  { %1766 = vmatpush3.bf16.msra.mxu0 %v1763_v25  ;;  %1798 = vmatpush3.bf16.msra.mxu1 %v1763_v25 }
  0x47   :  { %1800 = vmatprep.subr.bf16.mxu0 %v1799_v28  ;;  %1832 = vmatprep.subr.bf16.mxu1 %v1799_v28 }
  0x49   :  { %1348 = vmatmul.mubr.f32.vlgmr.msra.gmra.mrb[0].mxu0 %v41_v31  ;;  %1383 = vmatmul.mubr.f32.vlgmr.msra.gmra.mrb[0].mxu1 %v136_v32  ;;  %v567_v31 = vld [vmem:[#allocation5 + $0x190] sm:$0xff]  ;;  %v568_v32 = vld [vmem:[#allocation5 + $0x198] sm:$0xff] }
  0x4a   :  { %1802 = vmatpush3.bf16.msra.mxu0 %v1799_v28  ;;  %1834 = vmatpush3.bf16.msra.mxu1 %v1799_v28  ;;  %v1931_v37 = vpack.c.bf16 %v568_v32, %v567_v31 }
  0x4b   :  { %1804 = vmatprep.subr.bf16.mxu0 %v1803_v33  ;;  %1836 = vmatprep.subr.bf16.mxu1 %v1803_v33 }
  0x4e   :  { %1806 = vmatpush3.bf16.msra.mxu0 %v1803_v33  ;;  %1838 = vmatpush3.bf16.msra.mxu1 %v1803_v33 }
  0x4f   :  { %1808 = vmatprep.subr.bf16.mxu0 %v1807_v36  ;;  %1840 = vmatprep.subr.bf16.mxu1 %v1807_v36 }
  0x52   :  { %1810 = vmatpush3.bf16.msra.mxu0 %v1807_v36  ;;  %1842 = vmatpush3.bf16.msra.mxu1 %v1807_v36 }
  0x53   :  { %1812 = vmatprep.subr.bf16.mxu0 %v1811_v39  ;;  %1844 = vmatprep.subr.bf16.mxu1 %v1811_v39 }
  0x56   :  { %1814 = vmatpush3.bf16.msra.mxu0 %v1811_v39  ;;  %1846 = vmatpush3.bf16.msra.mxu1 %v1811_v39  ;;  %v570_v39 = vld [vmem:[#allocation5 + $0x1a8] sm:$0xff] }
  0x57   :  { %1816 = vmatprep.subr.bf16.mxu0 %v1815_v42  ;;  %1848 = vmatprep.subr.bf16.mxu1 %v1815_v42  ;;  %v1935_v40 = vpack.c.bf16 %v570_v39, %v569_v38  ;;  %v913_v39 = vld [vmem:[#allocation5 + $0x290] sm:$0xff] }
  0x5a   :  { %1818 = vmatpush3.bf16.msra.mxu0 %v1815_v42  ;;  %1850 = vmatpush3.bf16.msra.mxu1 %v1815_v42  ;;  %v572_v42 = vld [vmem:[#allocation5 + $0x1b8] sm:$0xff] }
  0x5b   :  { %1820 = vmatprep.subr.bf16.mxu0 %v1819_v45  ;;  %1852 = vmatprep.subr.bf16.mxu1 %v1819_v45  ;;  %v1939_v43 = vpack.c.bf16 %v572_v42, %v571_v41 }
  0x5e   :  { %1822 = vmatpush3.bf16.msra.mxu0 %v1819_v45  ;;  %1854 = vmatpush3.bf16.msra.mxu1 %v1819_v45  ;;  %v574_v45 = vld [vmem:[#allocation5 + $0x1c8] sm:$0xff] }
  0x5f   :  { %1824 = vmatprep.subr.bf16.mxu0 %v1823_v48  ;;  %1856 = vmatprep.subr.bf16.mxu1 %v1823_v48  ;;  %v1943_v46 = vpack.c.bf16 %v574_v45, %v573_v44 }
  0x62   :  { %1826 = vmatpush3.bf16.msra.mxu0 %v1823_v48  ;;  %1858 = vmatpush3.bf16.msra.mxu1 %v1823_v48  ;;  %v576_v48 = vld [vmem:[#allocation5 + $0x1d8] sm:$0xff] }
  0x63   :  { %1828 = vmatprep.subr.bf16.mxu0 %v1827_v51  ;;  %1860 = vmatprep.subr.bf16.mxu1 %v1827_v51  ;;  %v1947_v49 = vpack.c.bf16 %v576_v48, %v575_v47  ;;  %v916_v47 = vld [vmem:[#allocation5 + $0x2a8] sm:$0xff] }
  0x66   :  { %1830 = vmatpush3.bf16.msra.mxu0 %v1827_v51  ;;  %1862 = vmatpush3.bf16.msra.mxu1 %v1827_v51  ;;  %v578_v51 = vld [vmem:[#allocation5 + $0x1e8] sm:$0xff] }
  0x67   :  { %1864 = vmatprep.subr.bf16.mxu0 %v1863_v54  ;;  %1896 = vmatprep.subr.bf16.mxu1 %v1863_v54  ;;  %v1951_v52 = vpack.c.bf16 %v578_v51, %v577_v50  ;;  %v918_v50 = vld [vmem:[#allocation5 + $0x2b8] sm:$0xff] }
 0x11c   :  { %v2246_v55 = vpop.f32.mrb[0].mxu0  ;;  %v2248_v56 = vpop.f32.mrb[0].mxu1 }
 0x11d   :  { %v2250_v59 = vpop.f32.mrb[1].mxu0  ;;  %v2252_v60 = vpop.f32.mrb[1].mxu1  ;;  %v134_v63 = vmax.f32 %v2246_v55, 0.0  ;;  %v213_v0 = vmax.f32 %v2248_v56, 0.0  ;;  %v740_v56 = vld [vmem:[#allocation5 + $0x200] sm:$0xff] }
 0x11e   :  { %v133_v61 = vmax.f32 %v2250_v59, 0.0  ;;  %v212_v62 = vmax.f32 %v2252_v60, 0.0  ;;  %v1991_v58 = vpack.c.bf16 %v741_v57, %v740_v56  ;;  %v922_v56 = vld [vmem:[#allocation5 + $0x2d8] sm:$0xff] }
 0x120   :  { %1417 = vmatprep.mubr.f32.mxu0 %v133_v61  ;;  %1452 = vmatprep.mubr.f32.mxu1 %v212_v62 }
 0x121   :  { %1418 = vmatmul.mubr.f32.vlgmr.msra.gmra.mrb[2].mxu0 %v134_v63  ;;  %1453 = vmatmul.mubr.f32.vlgmr.msra.gmra.mrb[2].mxu1 %v213_v0 }
 0x122   :  { %1866 = vmatpush3.bf16.msra.mxu0 %v1863_v54  ;;  %1898 = vmatpush3.bf16.msra.mxu1 %v1863_v54  ;;  %v580_v54 = vld [vmem:[#allocation5 + $0x1f8] sm:$0xff] }
 0x123   :  { %1868 = vmatprep.subr.bf16.mxu0 %v1867_v1  ;;  %1900 = vmatprep.subr.bf16.mxu1 %v1867_v1  ;;  %v1955_v55 = vpack.c.bf16 %v580_v54, %v579_v53  ;;  %v920_v53 = vld [vmem:[#allocation5 + $0x2c8] sm:$0xff] }
 0x126   :  { %1870 = vmatpush3.bf16.msra.mxu0 %v1867_v1  ;;  %1902 = vmatpush3.bf16.msra.mxu1 %v1867_v1 }
 0x127   :  { %1872 = vmatprep.subr.bf16.mxu0 %v1871_v4  ;;  %1904 = vmatprep.subr.bf16.mxu1 %v1871_v4 }
 0x12a   :  { %1874 = vmatpush3.bf16.msra.mxu0 %v1871_v4  ;;  %1906 = vmatpush3.bf16.msra.mxu1 %v1871_v4  ;;  %v743_v4 = vld [vmem:[#allocation5 + $0x218] sm:$0xff] }
 0x12b   :  { %1876 = vmatprep.subr.bf16.mxu0 %v1875_v7  ;;  %1908 = vmatprep.subr.bf16.mxu1 %v1875_v7  ;;  %v1995_v9 = vpack.c.bf16 %v743_v4, %v742_v3 }
 0x12e   :  { %1878 = vmatpush3.bf16.msra.mxu0 %v1875_v7  ;;  %1910 = vmatpush3.bf16.msra.mxu1 %v1875_v7 }
 0x12f   :  { %1880 = vmatprep.subr.bf16.mxu0 %v1879_v10  ;;  %1912 = vmatprep.subr.bf16.mxu1 %v1879_v10 }
 0x132   :  { %1882 = vmatpush3.bf16.msra.mxu0 %v1879_v10  ;;  %1914 = vmatpush3.bf16.msra.mxu1 %v1879_v10  ;;  %v744_v10 = vld [vmem:[#allocation5 + $0x220] sm:$0xff] }
 0x133   :  { %1884 = vmatprep.subr.bf16.mxu0 %v1883_v13  ;;  %1916 = vmatprep.subr.bf16.mxu1 %v1883_v13  ;;  %v1999_v12 = vpack.c.bf16 %v745_v11, %v744_v10 }
 0x136   :  { %1886 = vmatpush3.bf16.msra.mxu0 %v1883_v13  ;;  %1918 = vmatpush3.bf16.msra.mxu1 %v1883_v13  ;;  %v746_v13 = vld [vmem:[#allocation5 + $0x230] sm:$0xff] }
 0x137   :  { %1888 = vmatprep.subr.bf16.mxu0 %v1887_v16  ;;  %1920 = vmatprep.subr.bf16.mxu1 %v1887_v16  ;;  %v2003_v15 = vpack.c.bf16 %v747_v14, %v746_v13 }
 0x13a   :  { %1890 = vmatpush3.bf16.msra.mxu0 %v1887_v16  ;;  %1922 = vmatpush3.bf16.msra.mxu1 %v1887_v16  ;;  %v748_v16 = vld [vmem:[#allocation5 + $0x240] sm:$0xff] }
 0x13b   :  { %1892 = vmatprep.subr.bf16.mxu0 %v1891_v19  ;;  %1924 = vmatprep.subr.bf16.mxu1 %v1891_v19  ;;  %v2007_v18 = vpack.c.bf16 %v749_v17, %v748_v16 }
 0x13e   :  { %1894 = vmatpush3.bf16.msra.mxu0 %v1891_v19  ;;  %1926 = vmatpush3.bf16.msra.mxu1 %v1891_v19  ;;  %v750_v19 = vld [vmem:[#allocation5 + $0x250] sm:$0xff] }
 0x13f   :  { %1928 = vmatprep.subr.bf16.mxu0 %v1927_v22  ;;  %1960 = vmatprep.subr.bf16.mxu1 %v1927_v22  ;;  %v2011_v21 = vpack.c.bf16 %v751_v20, %v750_v19 }
 0x1f4   :  { %v1419_v23 = vpop.f32.mrb[2].mxu0  ;;  %v1454_v24 = vpop.f32.mrb[2].mxu1 }
 0x1f5   :  { %v382_v25 = vmax.f32 %v1419_v23, 0.0  ;;  %v386_v26 = vmax.f32 %v1454_v24, 0.0  ;;  %v297_v27 = vpop.f32.mrb[3].mxu0  ;;  %v372_v28 = vpop.f32.mrb[3].mxu1  ;;  %v753_v23 = vld [vmem:[#allocation5 + $0x268] sm:$0xff] }
 0x1f6   :  { %v381_v29 = vmax.f32 %v297_v27, 0.0  ;;  %v385_v30 = vmax.f32 %v372_v28, 0.0  ;;  %v911_v28 = vld [vmem:[#allocation5 + $0x280] sm:$0xff] }
 0x1f7   :  { %v2276_v35 = vadd.f32 %v382_v25, %v134_v63  ;;  %v2280_v36 = vadd.f32 %v386_v26, %v213_v0  ;;  %v754_v25 = vld [vmem:[#allocation5 + $0x270] sm:$0xff]  ;;  %v755_v26 = vld [vmem:[#allocation5 + $0x278] sm:$0xff] }
 0x1f8   :  { %v2268_v33 = vadd.f32 %v381_v29, %v133_v61  ;;  %v2272_v34 = vadd.f32 %v385_v30, %v212_v62  ;;  %v2019_v27 = vpack.c.bf16 %v755_v26, %v754_v25  ;;  %v912_v29 = vld [vmem:[#allocation5 + $0x288] sm:$0xff] }
 0x1f9   :  { %v2055_v30 = vpack.c.bf16 %v912_v29, %v911_v28 }
 0x1fa   :  { %1487 = vmatprep.mubr.f32.mxu0 %v2268_v33  ;;  %1522 = vmatprep.mubr.f32.mxu1 %v2272_v34 }
 0x1fb   :  { %1488 = vmatmul.mubr.f32.vlgmr.msra.gmra.mrb[4].mxu0 %v2276_v35  ;;  %1523 = vmatmul.mubr.f32.vlgmr.msra.gmra.mrb[4].mxu1 %v2280_v36 }
 0x1fc   :  { %1930 = vmatpush3.bf16.msra.mxu0 %v1927_v22  ;;  %1962 = vmatpush3.bf16.msra.mxu1 %v1927_v22  ;;  %v752_v22 = vld [vmem:[#allocation5 + $0x260] sm:$0xff] }
 0x1fd   :  { %1932 = vmatprep.subr.bf16.mxu0 %v1931_v37  ;;  %1964 = vmatprep.subr.bf16.mxu1 %v1931_v37  ;;  %v2015_v24 = vpack.c.bf16 %v753_v23, %v752_v22 }
 0x200   :  { %1934 = vmatpush3.bf16.msra.mxu0 %v1931_v37  ;;  %1966 = vmatpush3.bf16.msra.mxu1 %v1931_v37 }
 0x201   :  { %1936 = vmatprep.subr.bf16.mxu0 %v1935_v40  ;;  %1968 = vmatprep.subr.bf16.mxu1 %v1935_v40 }
 0x204   :  { %1938 = vmatpush3.bf16.msra.mxu0 %v1935_v40  ;;  %1970 = vmatpush3.bf16.msra.mxu1 %v1935_v40  ;;  %v914_v40 = vld [vmem:[#allocation5 + $0x298] sm:$0xff] }
 0x205   :  { %1940 = vmatprep.subr.bf16.mxu0 %v1939_v43  ;;  %1972 = vmatprep.subr.bf16.mxu1 %v1939_v43  ;;  %v2059_v45 = vpack.c.bf16 %v914_v40, %v913_v39 }
 0x208   :  { %1942 = vmatpush3.bf16.msra.mxu0 %v1939_v43  ;;  %1974 = vmatpush3.bf16.msra.mxu1 %v1939_v43 }
 0x209   :  { %1944 = vmatprep.subr.bf16.mxu0 %v1943_v46  ;;  %1976 = vmatprep.subr.bf16.mxu1 %v1943_v46 }
 0x20c   :  { %1946 = vmatpush3.bf16.msra.mxu0 %v1943_v46  ;;  %1978 = vmatpush3.bf16.msra.mxu1 %v1943_v46  ;;  %v915_v46 = vld [vmem:[#allocation5 + $0x2a0] sm:$0xff] }
 0x20d   :  { %1948 = vmatprep.subr.bf16.mxu0 %v1947_v49  ;;  %1980 = vmatprep.subr.bf16.mxu1 %v1947_v49  ;;  %v2063_v48 = vpack.c.bf16 %v916_v47, %v915_v46 }
 0x210   :  { %1950 = vmatpush3.bf16.msra.mxu0 %v1947_v49  ;;  %1982 = vmatpush3.bf16.msra.mxu1 %v1947_v49  ;;  %v917_v49 = vld [vmem:[#allocation5 + $0x2b0] sm:$0xff] }
 0x211   :  { %1952 = vmatprep.subr.bf16.mxu0 %v1951_v52  ;;  %1984 = vmatprep.subr.bf16.mxu1 %v1951_v52  ;;  %v2067_v51 = vpack.c.bf16 %v918_v50, %v917_v49 }
 0x214   :  { %1954 = vmatpush3.bf16.msra.mxu0 %v1951_v52  ;;  %1986 = vmatpush3.bf16.msra.mxu1 %v1951_v52  ;;  %v919_v52 = vld [vmem:[#allocation5 + $0x2c0] sm:$0xff] }
 0x215   :  { %1956 = vmatprep.subr.bf16.mxu0 %v1955_v55  ;;  %1988 = vmatprep.subr.bf16.mxu1 %v1955_v55  ;;  %v2071_v54 = vpack.c.bf16 %v920_v53, %v919_v52 }
 0x218   :  { %1958 = vmatpush3.bf16.msra.mxu0 %v1955_v55  ;;  %1990 = vmatpush3.bf16.msra.mxu1 %v1955_v55  ;;  %v921_v55 = vld [vmem:[#allocation5 + $0x2d0] sm:$0xff] }
 0x219   :  { %1992 = vmatprep.subr.bf16.mxu0 %v1991_v58  ;;  %2024 = vmatprep.subr.bf16.mxu1 %v1991_v58  ;;  %v2075_v57 = vpack.c.bf16 %v922_v56, %v921_v55 }
 0x2ce   :  { %v1489_v59 = vpop.f32.mrb[4].mxu0  ;;  %v1524_v60 = vpop.f32.mrb[4].mxu1 }
 0x2cf   :  { %v557_v61 = vmax.f32 %v1489_v59, 0.0  ;;  %v561_v62 = vmax.f32 %v1524_v60, 0.0  ;;  %v472_v63 = vpop.f32.mrb[5].mxu0  ;;  %v547_v0 = vpop.f32.mrb[5].mxu1  ;;  %v924_v59 = vld [vmem:[#allocation5 + $0x2e8] sm:$0xff] }
 0x2d0   :  { %v556_v1 = vmax.f32 %v472_v63, 0.0  ;;  %v560_v2 = vmax.f32 %v547_v0, 0.0 }
 0x2d1   :  { %v2293_v7 = vadd.f32 %v557_v61, %v2276_v35  ;;  %v2296_v8 = vadd.f32 %v561_v62, %v2280_v36  ;;  %v925_v61 = vld [vmem:[#allocation5 + $0x2f0] sm:$0xff]  ;;  %v926_v62 = vld [vmem:[#allocation5 + $0x2f8] sm:$0xff] }
 0x2d2   :  { %v2287_v5 = vadd.f32 %v556_v1, %v2268_v33  ;;  %v2290_v6 = vadd.f32 %v560_v2, %v2272_v34  ;;  %v2083_v63 = vpack.c.bf16 %v926_v62, %v925_v61 }
 0x2d4   :  { %1557 = vmatprep.mubr.f32.mxu0 %v2287_v5  ;;  %1592 = vmatprep.mubr.f32.mxu1 %v2290_v6 }
 0x2d5   :  { %1558 = vmatmul.mubr.f32.vlgmr.msra.gmra.mrb[6].mxu0 %v2293_v7  ;;  %1593 = vmatmul.mubr.f32.vlgmr.msra.gmra.mrb[6].mxu1 %v2296_v8 }
 0x2d6   :  { %1994 = vmatpush3.bf16.msra.mxu0 %v1991_v58  ;;  %2026 = vmatpush3.bf16.msra.mxu1 %v1991_v58  ;;  %v923_v58 = vld [vmem:[#allocation5 + $0x2e0] sm:$0xff] }
 0x2d7   :  { %1996 = vmatprep.subr.bf16.mxu0 %v1995_v9  ;;  %2028 = vmatprep.subr.bf16.mxu1 %v1995_v9  ;;  %v2079_v60 = vpack.c.bf16 %v924_v59, %v923_v58 }
 0x2da   :  { %1998 = vmatpush3.bf16.msra.mxu0 %v1995_v9  ;;  %2030 = vmatpush3.bf16.msra.mxu1 %v1995_v9 }
 0x2db   :  { %2000 = vmatprep.subr.bf16.mxu0 %v1999_v12  ;;  %2032 = vmatprep.subr.bf16.mxu1 %v1999_v12 }
 0x2de   :  { %2002 = vmatpush3.bf16.msra.mxu0 %v1999_v12  ;;  %2034 = vmatpush3.bf16.msra.mxu1 %v1999_v12 }
 0x2df   :  { %2004 = vmatprep.subr.bf16.mxu0 %v2003_v15  ;;  %2036 = vmatprep.subr.bf16.mxu1 %v2003_v15 }
 0x2e2   :  { %2006 = vmatpush3.bf16.msra.mxu0 %v2003_v15  ;;  %2038 = vmatpush3.bf16.msra.mxu1 %v2003_v15 }
 0x2e3   :  { %2008 = vmatprep.subr.bf16.mxu0 %v2007_v18  ;;  %2040 = vmatprep.subr.bf16.mxu1 %v2007_v18 }
 0x2e6   :  { %2010 = vmatpush3.bf16.msra.mxu0 %v2007_v18  ;;  %2042 = vmatpush3.bf16.msra.mxu1 %v2007_v18 }
 0x2e7   :  { %2012 = vmatprep.subr.bf16.mxu0 %v2011_v21  ;;  %2044 = vmatprep.subr.bf16.mxu1 %v2011_v21 }
 0x2ea   :  { %2014 = vmatpush3.bf16.msra.mxu0 %v2011_v21  ;;  %2046 = vmatpush3.bf16.msra.mxu1 %v2011_v21 }
 0x2eb   :  { %2016 = vmatprep.subr.bf16.mxu0 %v2015_v24  ;;  %2048 = vmatprep.subr.bf16.mxu1 %v2015_v24 }
 0x2ee   :  { %2018 = vmatpush3.bf16.msra.mxu0 %v2015_v24  ;;  %2050 = vmatpush3.bf16.msra.mxu1 %v2015_v24 }
 0x2ef   :  { %2020 = vmatprep.subr.bf16.mxu0 %v2019_v27  ;;  %2052 = vmatprep.subr.bf16.mxu1 %v2019_v27 }
 0x2f2   :  { %2022 = vmatpush3.bf16.msra.mxu0 %v2019_v27  ;;  %2054 = vmatpush3.bf16.msra.mxu1 %v2019_v27 }
 0x2f3   :  { %2056 = vmatprep.subr.bf16.mxu0 %v2055_v30  ;;  %2088 = vmatprep.subr.bf16.mxu1 %v2055_v30 }
 0x3a8   :  { %v1559_v31 = vpop.f32.mrb[6].mxu0  ;;  %v1594_v32 = vpop.f32.mrb[6].mxu1 }
 0x3a9   :  { %v732_v33 = vmax.f32 %v1559_v31, 0.0  ;;  %v736_v34 = vmax.f32 %v1594_v32, 0.0  ;;  %v647_v35 = vpop.f32.mrb[7].mxu0  ;;  %v722_v36 = vpop.f32.mrb[7].mxu1 }
 0x3aa   :  { %v731_v37 = vmax.f32 %v647_v35, 0.0  ;;  %v735_v38 = vmax.f32 %v722_v36, 0.0 }
 0x3ab   :  { %v734_v43 = vadd.f32 %v732_v33, %v2293_v7  ;;  %v738_v44 = vadd.f32 %v736_v34, %v2296_v8 }
 0x3ac   :  { %v733_v41 = vadd.f32 %v731_v37, %v2287_v5  ;;  %v737_v42 = vadd.f32 %v735_v38, %v2290_v6 }
 0x3ae   :  { %1627 = vmatprep.mubr.f32.mxu0 %v733_v41  ;;  %1662 = vmatprep.mubr.f32.mxu1 %v737_v42 }
 0x3af   :  { %1628 = vmatmul.mubr.f32.vlgmr.msra.gmra.mrb[8].mxu0 %v734_v43  ;;  %1663 = vmatmul.mubr.f32.vlgmr.msra.gmra.mrb[8].mxu1 %v738_v44 }
 0x3b0   :  { %2058 = vmatpush3.bf16.msra.mxu0 %v2055_v30  ;;  %2090 = vmatpush3.bf16.msra.mxu1 %v2055_v30 }
 0x3b1   :  { %2060 = vmatprep.subr.bf16.mxu0 %v2059_v45  ;;  %2092 = vmatprep.subr.bf16.mxu1 %v2059_v45 }
 0x3b4   :  { %2062 = vmatpush3.bf16.msra.mxu0 %v2059_v45  ;;  %2094 = vmatpush3.bf16.msra.mxu1 %v2059_v45 }
 0x3b5   :  { %2064 = vmatprep.subr.bf16.mxu0 %v2063_v48  ;;  %2096 = vmatprep.subr.bf16.mxu1 %v2063_v48 }
 0x3b8   :  { %2066 = vmatpush3.bf16.msra.mxu0 %v2063_v48  ;;  %2098 = vmatpush3.bf16.msra.mxu1 %v2063_v48 }
 0x3b9   :  { %2068 = vmatprep.subr.bf16.mxu0 %v2067_v51  ;;  %2100 = vmatprep.subr.bf16.mxu1 %v2067_v51 }
 0x3bc   :  { %2070 = vmatpush3.bf16.msra.mxu0 %v2067_v51  ;;  %2102 = vmatpush3.bf16.msra.mxu1 %v2067_v51 }
 0x3bd   :  { %2072 = vmatprep.subr.bf16.mxu0 %v2071_v54  ;;  %2104 = vmatprep.subr.bf16.mxu1 %v2071_v54 }
 0x3c0   :  { %2074 = vmatpush3.bf16.msra.mxu0 %v2071_v54  ;;  %2106 = vmatpush3.bf16.msra.mxu1 %v2071_v54 }
 0x3c1   :  { %2076 = vmatprep.subr.bf16.mxu0 %v2075_v57  ;;  %2108 = vmatprep.subr.bf16.mxu1 %v2075_v57 }
 0x3c4   :  { %2078 = vmatpush3.bf16.msra.mxu0 %v2075_v57  ;;  %2110 = vmatpush3.bf16.msra.mxu1 %v2075_v57 }
 0x3c5   :  { %2080 = vmatprep.subr.bf16.mxu0 %v2079_v60  ;;  %2112 = vmatprep.subr.bf16.mxu1 %v2079_v60 }
 0x3c8   :  { %2082 = vmatpush3.bf16.msra.mxu0 %v2079_v60  ;;  %2114 = vmatpush3.bf16.msra.mxu1 %v2079_v60 }
 0x3c9   :  { %2084 = vmatprep.subr.bf16.mxu0 %v2083_v63  ;;  %2116 = vmatprep.subr.bf16.mxu1 %v2083_v63 }
 0x3cc   :  { %2086 = vmatpush3.bf16.msra.mxu0 %v2083_v63  ;;  %2118 = vmatpush3.bf16.msra.mxu1 %v2083_v63 }
 0x482   :  { %v1629_v0 = vpop.f32.mrb[8].mxu0  ;;  %v1664_v1 = vpop.f32.mrb[8].mxu1 }
 0x483   :  { %v822_v2 = vpop.f32.mrb[9].mxu0  ;;  %v897_v3 = vpop.f32.mrb[9].mxu1  ;;  %v907_v6 = vadd.f32 %v1629_v0, %v734_v43  ;;  %v909_v7 = vadd.f32 %v1664_v1, %v738_v44 }
 0x484   :  { %v906_v4 = vadd.f32 %v822_v2, %v733_v41  ;;  %v908_v5 = vadd.f32 %v897_v3, %v737_v42 }
 0x486   :  { %1697 = vmatprep.mubr.f32.mxu0 %v906_v4  ;;  %1732 = vmatprep.mubr.f32.mxu1 %v908_v5 }
 0x487   :  { %1698 = vmatmul.mubr.f32.vlgmr.msra.gmra.mrb[10].mxu0 %v907_v6  ;;  %1733 = vmatmul.mubr.f32.vlgmr.msra.gmra.mrb[10].mxu1 %v909_v7 }
 0x55a   :  { %v1699_v8 = vpop.f32.mrb[10].mxu0  ;;  %v1734_v9 = vpop.f32.mrb[10].mxu1 }
 0x55b   :  { %1003 = vst [vmem:[#allocation7 + $0x8] sm:$0xff] %v1699_v8  ;;  %1080 = vst [vmem:[#allocation7 + $0x18] sm:$0xff] %v1734_v9  ;;  %v993_v10 = vpop.f32.mrb[11].mxu0  ;;  %v1070_v11 = vpop.f32.mrb[11].mxu1 }
 0x55c   :  { %1002 = vst [vmem:[#allocation7] sm:$0xff] %v993_v10  ;;  %1079 = vst [vmem:[#allocation7 + $0x10] sm:$0xff] %v1070_v11 }
 0x55d   :  { %2179 = shalt.err (!%p2176_p6)
}
 0x55e   :  { %s2180_s10 = scalar_lea.hbm %s2323_s2, 512 }
 0x55f   :  { %p2181_p7 = scmp.ne.s32.totalorder %s2323_s2, %s2180_s10  ;;  %p2184_p8 = scmp.lt.u32.totalorder %s2180_s10, %s2323_s2 }
 0x561   :  { %p2186_p9 = pnand %p2184_p8, %p2181_p7 }
 0x563   :  { %2189 = shalt.err (!%p2186_p9)
}
 0x564   :  { %1092 = dma.vmem_to_hbm [thread:$0]  %s1087_s6, 512, %s2323_s2, [#allocation4], %s2197_s19, %s2197_s19, %s2198_s20  }
 0x565   :  { %2194 = dma.done.wait [#allocation4], 512  }
 0x566   :  { %2195 = vsyncadd [#allocation4], 4294966784 }
 0x567   :  { %1096 = vsyncpa [#allocation3], 1 }
 0x568   :  { %1097 = vsyncpa [#allocation6], 1 }
 0x569   :  { %1098 = vsyncpa [#allocation4], 1 }

</bundles_post_ra>
